<compile_context>
chip_gen: v6e
topology: v6e:2x2x1
jax: 0.10.0
libtpu: 0.0.40
codegen_flags: <defaults>
</compile_context>

<pallas_src>
import functools
import math

import jax
import jax.numpy as jnp
from jax import lax
from jax.experimental import pallas as pl
from jax.experimental.pallas import tpu as pltpu


# ----------------------------------------------------------------------------
# Kernel: folded 3x3 conv (padding=1, stride-1 "wide" output) for one block of
# nb images.  Per grid step:
#   - cast the whole (nb, Cin, Hp*Wp) block to bf16 once,
#   - build im2col patches with 9 contiguous lane slices (one per tap),
#   - one batched MXU dot: nb x [(Cout, 9*Cin) @ (9*Cin, Ho_s1*Wp)],
#   - lane-dense store of (nb, Cout, Ho_s1*Wp).
# Wrap columns / garbage rows are sliced off (and stride>1 decimated) in the wrapper.
# ----------------------------------------------------------------------------
def _lowrank_conv_kernel(x_ref, wk_ref, o_ref, *, wp, ncols):
    # x_ref : (nb, Cin, Hp*Wp)   padded images, channels-major, spatial on lanes (f32)
    # wk_ref: (Cout, 9*Cin)      folded weight, bf16, columns ordered (kh, kw, cin)
    # o_ref : (nb, Cout, ncols)  ncols = H_s1 * Wp (stride-1 wide output)
    nb, cin, _ = x_ref.shape
    cout, k9 = wk_ref.shape

    xb = x_ref[...].astype(jnp.bfloat16)                 # single cast, BEFORE im2col

    # im2col over the whole block: tap (kh, kw) for every (stride-1) output position
    # is one contiguous lane slice of the flattened padded images.
    pieces = [xb[:, :, kh * wp + kw: kh * wp + kw + ncols]
              for kh in range(3) for kw in range(3)]     # 9 x (nb, Cin, ncols)
    patches = jnp.concatenate(pieces, axis=1)            # (nb, 9*Cin, ncols) bf16

    wb = jnp.broadcast_to(wk_ref[...], (nb, cout, k9))   # tiny; once per grid step
    out = lax.dot_general(                                # nb batched MXU dots, f32 acc
        wb, patches,
        dimension_numbers=(((2,), (1,)), ((0,), (0,))),
        preferred_element_type=jnp.float32)              # (nb, Cout, ncols)
    o_ref[...] = out.astype(o_ref.dtype)


# ----------------------------------------------------------------------------
# Python wrapper
# ----------------------------------------------------------------------------
def low_rank_conv3x3_forward(x_nchw, w_u, w_v, stride=1, batch_block=None):
    """x_nchw: (N, Cin, H, W) f32; w_u: (E, Cin, 3, 3); w_v: (Cout, E, 1, 1).

    Returns (out_nchw: (N, Cout, Ho, Wo), dynamic_weight_norm: scalar f32).
    """
    n, cin, h, w = x_nchw.shape
    cout = w_v.shape[0]
    ho = (h + 2 - 3) // stride + 1
    wo = (w + 2 - 3) // stride + 1
    wp = w + 2                      # 1-pixel halo left/right
    hp = h + 3                      # 1 halo top, 1 halo + 1 slack row bottom
    ncols = h * wp                  # stride-1 wide output columns per image

    # every tap slice must stay inside the flattened padded image
    assert (2 * wp + 2) + (ncols - 1) < hp * wp

    # Fold V (1x1) into U (3x3) -- exact for the 'linear' path (tiny op, keep exact).
    v2d = w_v[:, :, 0, 0]                                           # (Cout, E)
    w_eff = jnp.einsum('oe,ecij->ocij', v2d, w_u,
                       precision=jax.lax.Precision.HIGHEST)         # (Cout, Cin, 3, 3)
    # dynamic_weight_norm == sum((V @ U_flat)**2) == sum(W_eff**2)  (wrapper, f32, once)
    wnorm = jnp.sum(w_eff * w_eff)
    # Flatten with column order (kh, kw, cin) to match the in-kernel im2col row order;
    # ship bf16 to the kernel (single-pass MXU operand).
    w_k = jnp.transpose(w_eff, (0, 2, 3, 1)).reshape(cout, 9 * cin).astype(jnp.bfloat16)

    # Channels-major throughout; one small pad, then a free (metadata) reshape.
    x_pad = jnp.pad(x_nchw, ((0, 0), (0, 0), (1, 2), (1, 1)))       # (N, Cin, Hp, Wp)
    x_flat = x_pad.reshape(n, cin, hp * wp)

    # Images per grid step: big blocks amortize the fixed per-step cost; zero-pad the
    # batch instead of asserting divisibility.
    nb = batch_block if batch_block is not None else min(n, 64)
    n_pad = pl.cdiv(n, nb) * nb
    if n_pad != n:
        x_flat = jnp.pad(x_flat, ((0, n_pad - n), (0, 0), (0, 0)))

    kernel = functools.partial(_lowrank_conv_kernel, wp=wp, ncols=ncols)

    out_wide = pl.pallas_call(
        kernel,
        out_shape=jax.ShapeDtypeStruct((n_pad, cout, ncols), x_nchw.dtype),
        grid_spec=pltpu.PrefetchScalarGridSpec(
            num_scalar_prefetch=0,
            grid=(n_pad // nb,),
            in_specs=[
                pl.BlockSpec((nb, cin, hp * wp), lambda b: (b, 0, 0)),
                pl.BlockSpec((cout, 9 * cin), lambda b: (0, 0)),
            ],
            out_specs=pl.BlockSpec((nb, cout, ncols), lambda b: (b, 0, 0)),
        ),
        compiler_params=pltpu.CompilerParams(
            # no shared output block anymore -> batch axis is truly parallel
            dimension_semantics=("parallel",)),
    )(x_flat, w_k)

    # Drop padded batch entries, decimate the stride-1 wide output (no-op for
    # stride=1) and slice off the wrap columns.  Output is already NCHW-ordered.
    out = out_wide[:n].reshape(n, cout, h, wp)
    out_nchw = out[:, :, ::stride, ::stride][:, :, :ho, :wo]
    return out_nchw, wnorm


def isoflop_width_control(f_in, f_out, sparsity=0.0, sparse_u_only=False):
    if sparse_u_only:
        expanded = 3 * 3 * f_in * f_out / ((1 - sparsity) * (3 * 3) * f_in + f_out)
    else:
        expanded = 3 * 3 * f_in * f_out / ((1 - sparsity) * (3 * 3 * f_in + f_out))
    return int(math.ceil(expanded))


# ----------------------------------------------------------------------------
# Reference (pure JAX, full f32) for correctness check
# ----------------------------------------------------------------------------
def _reference_forward(x_nchw, w_u, w_v, stride=1):
    dn = ("NCHW", "OIHW", "NCHW")
    u_out = jax.lax.conv_general_dilated(
        x_nchw, w_u, (stride, stride), ((1, 1), (1, 1)),
        dimension_numbers=dn, precision=jax.lax.Precision.HIGHEST)
    out = jax.lax.conv_general_dilated(
        u_out, w_v, (1, 1), "VALID",
        dimension_numbers=dn, precision=jax.lax.Precision.HIGHEST)
    e = w_u.shape[0]
    wnorm = jnp.sum(jnp.matmul(w_v[:, :, 0, 0], w_u.reshape(e, -1),
                               precision=jax.lax.Precision.HIGHEST) ** 2)
    return out, wnorm


if __name__ == "__main__":
    # Small shapes consistent with the module (CIFAR-style conv block).
    f_in, f_out = 4, 8
    N, H, W = 2, 16, 16
    E = isoflop_width_control(f_in, f_out, sparsity=0.0)   # = 7

    key = jax.random.PRNGKey(0)
    kx, ku, kv = jax.random.split(key, 3)

    x = jax.random.normal(kx, (N, f_in, H, W), dtype=jnp.float32)

    # kaiming_normal_(mode='fan_out', nonlinearity='relu'):
    #   std = sqrt(2 / (out_channels * receptive_field_size))
    std_u = math.sqrt(2.0 / (E * 3 * 3))
    std_v = math.sqrt(2.0 / (f_out * 1 * 1))
    w_u = std_u * jax.random.normal(ku, (E, f_in, 3, 3), dtype=jnp.float32)
    w_v = std_v * jax.random.normal(kv, (f_out, E, 1, 1), dtype=jnp.float32)

    for stride in (1, 2):
        fwd = jax.jit(functools.partial(low_rank_conv3x3_forward, stride=stride))
        out, wnorm = fwd(x, w_u, w_v)
        out = jax.block_until_ready(out)
        wnorm = jax.block_until_ready(wnorm)

        ref_out, ref_wnorm = _reference_forward(x, w_u, w_v, stride=stride)
        assert out.shape == ref_out.shape, (out.shape, ref_out.shape)
        # kernel multiplies in bf16 (f32 accumulation); compare vs full-f32 reference
        assert jnp.allclose(out, ref_out, atol=5e-2, rtol=5e-2), \
            f"conv output mismatch (stride={stride})"
        assert jnp.allclose(wnorm, ref_wnorm, atol=1e-3, rtol=1e-3), \
            f"weight norm mismatch (stride={stride})"

    print("KERNEL_OK")
</pallas_src>

<mosaic_0001>
module attributes {stable_mosaic.version = 11 : i64} {
  func.func @_lowrank_conv_kernel(%arg0: i32, %arg1: memref<2x4x342xf32, #tpu.memory_space<vmem>>, %arg2: memref<8x36xbf16, #tpu.memory_space<vmem>>, %arg3: memref<2x8x288xf32, #tpu.memory_space<vmem>>) attributes {dimension_semantics = [#tpu.dimension_semantics<parallel>], iteration_bounds = array<i64: 1>, scalar_prefetch = 0 : i64, scratch_operands = 0 : i64, tpu.core_type = #tpu.core_type<tc>, window_params = [{transform_indices = @transform_0, window_bounds = array<i64: 2, 4, 342>}, {pipeline_mode = #tpu.pipeline_mode<synchronous>, transform_indices = @transform_1, window_bounds = array<i64: 8, 36>}, {transform_indices = @transform_2, window_bounds = array<i64: 2, 8, 288>}]} {
    %c0 = arith.constant 0 : index
    %c0_0 = arith.constant 0 : index
    %c0_1 = arith.constant 0 : index
    %0 = vector.load %arg1[%c0, %c0_0, %c0_1] : memref<2x4x342xf32, #tpu.memory_space<vmem>>, vector<2x4x342xf32>
    %1 = arith.truncf %0 : vector<2x4x342xf32> to vector<2x4x342xbf16>
    %2 = vector.extract_strided_slice %1 {offsets = [0, 0, 0], sizes = [2, 4, 288], strides = [1, 1, 1]} : vector<2x4x342xbf16> to vector<2x4x288xbf16>
    %3 = vector.extract_strided_slice %1 {offsets = [0, 0, 1], sizes = [2, 4, 288], strides = [1, 1, 1]} : vector<2x4x342xbf16> to vector<2x4x288xbf16>
    %4 = vector.extract_strided_slice %1 {offsets = [0, 0, 2], sizes = [2, 4, 288], strides = [1, 1, 1]} : vector<2x4x342xbf16> to vector<2x4x288xbf16>
    %5 = vector.extract_strided_slice %1 {offsets = [0, 0, 18], sizes = [2, 4, 288], strides = [1, 1, 1]} : vector<2x4x342xbf16> to vector<2x4x288xbf16>
    %6 = vector.extract_strided_slice %1 {offsets = [0, 0, 19], sizes = [2, 4, 288], strides = [1, 1, 1]} : vector<2x4x342xbf16> to vector<2x4x288xbf16>
    %7 = vector.extract_strided_slice %1 {offsets = [0, 0, 20], sizes = [2, 4, 288], strides = [1, 1, 1]} : vector<2x4x342xbf16> to vector<2x4x288xbf16>
    %8 = vector.extract_strided_slice %1 {offsets = [0, 0, 36], sizes = [2, 4, 288], strides = [1, 1, 1]} : vector<2x4x342xbf16> to vector<2x4x288xbf16>
    %9 = vector.extract_strided_slice %1 {offsets = [0, 0, 37], sizes = [2, 4, 288], strides = [1, 1, 1]} : vector<2x4x342xbf16> to vector<2x4x288xbf16>
    %10 = vector.extract_strided_slice %1 {offsets = [0, 0, 38], sizes = [2, 4, 288], strides = [1, 1, 1]} : vector<2x4x342xbf16> to vector<2x4x288xbf16>
    %11 = tpu.concatenate %2, %3, %4, %5, %6, %7, %8, %9, %10 in 1 : vector<2x4x288xbf16>, vector<2x4x288xbf16>, vector<2x4x288xbf16>, vector<2x4x288xbf16>, vector<2x4x288xbf16>, vector<2x4x288xbf16>, vector<2x4x288xbf16>, vector<2x4x288xbf16>, vector<2x4x288xbf16> -> vector<2x36x288xbf16>
    %c0_2 = arith.constant 0 : index
    %c0_3 = arith.constant 0 : index
    %12 = vector.load %arg2[%c0_2, %c0_3] : memref<8x36xbf16, #tpu.memory_space<vmem>>, vector<8x36xbf16>
    %13 = vector.shape_cast %12 : vector<8x36xbf16> to vector<1x8x36xbf16>
    %14 = vector.broadcast %13 : vector<1x8x36xbf16> to vector<2x8x36xbf16>
    %cst = arith.constant dense<0.000000e+00> : vector<2x8x288xf32>
    %15 = tpu.matmul %14, %11, %cst {dimension_numbers = #tpu.dot_dimension_numbers<[2], [1], [1], [2], [0, 0, 0, 1, 1, 2], [0], [0]>} : vector<2x8x36xbf16>, vector<2x36x288xbf16>, vector<2x8x288xf32> -> vector<2x8x288xf32>
    %c0_4 = arith.constant 0 : index
    %c0_5 = arith.constant 0 : index
    %c0_6 = arith.constant 0 : index
    %16 = vector.load %arg3[%c0_4, %c0_5, %c0_6] : memref<2x8x288xf32, #tpu.memory_space<vmem>>, vector<2x8x288xf32>
    tpu.vector_store %arg3[%c0_4, %c0_5, %c0_6], %15 {strides = array<i32>} : memref<2x8x288xf32, #tpu.memory_space<vmem>>, vector<2x8x288xf32>,
    return
  }
  func.func @transform_0(%arg0: i32) -> (i32, i32, i32) {
    %c0_i32 = arith.constant 0 : i32
    %c0_i32_0 = arith.constant 0 : i32
    %c0_i32_1 = arith.constant 0 : i32
    return %arg0, %c0_i32, %c0_i32_0 : i32, i32, i32
  }
  func.func @transform_1(%arg0: i32) -> (i32, i32) {
    %c0_i32 = arith.constant 0 : i32
    %c0_i32_0 = arith.constant 0 : i32
    %c0_i32_1 = arith.constant 0 : i32
    return %c0_i32, %c0_i32_0 : i32, i32
  }
  func.func @transform_2(%arg0: i32) -> (i32, i32, i32) {
    %c0_i32 = arith.constant 0 : i32
    %c0_i32_0 = arith.constant 0 : i32
    %c0_i32_1 = arith.constant 0 : i32
    return %arg0, %c0_i32, %c0_i32_0 : i32, i32, i32
  }
}

</mosaic_0001>

<bundles_post_ra>
// kernel: low_rank_conv3x3_forward.1
= control target key start
LH: loop header
LB: loop body
LE: loop exit
PB: predicated region body
PF: predicated region fallthrough
CT: control target
= control target key end

     0   :  { %v530_v2 = vmov 0.0   ;;  %s531_s13 = smov 90   ;;  %s532_s14 = smov 109   ;;  %vm538_vm0 = vmmov 0   ;;  %v540_v18 = vmov 0   ;;  %vm188_vm1 = vcmask 1041408   ;;  %s781_s0 = inlined_call_operand.vmem [shape: f32[2,4,342], index: 0, kind: input, shape index: {}]   ;;  %s782_s1 = inlined_call_operand.vmem [shape: bf16[8,36], index: 1, kind: input, shape index: {}]   ;;  %s783_s2 = inlined_call_operand.vmem [shape: f32[2,8,288], index: 2, kind: output, shape index: {}]  }
   0x1   :  { %v13_v0 = vld [vmem:[%s781_s0 + $0x8] sm:$0xf]  ;;  %v12_v1 = vld [vmem:[%s781_s0] sm:$0xff]  ;;  %497 = vmatprep.subr.bf16.mxu1 %v530_v2  ;;  %s533_s15 = smov 108   ;;  %s534_s16 = smov 92   ;;  %v14_v16 = vld [vmem:[%s781_s0 + $0xc] sm:$0xff]  ;;  %503 = vmatprep.mubr.msk.bf16.mxu1 %vm538_vm0, %v530_v2 }
   0x2   :  { %v563_v3 = vpack.c.bf16 %v13_v0, %v13_v0  ;;  %v565_v4 = vpack.c.bf16 %v12_v1, %v12_v1  ;;  %v18_v5 = vcombine.high %v12_v1, %v12_v1  ;;  %s535_s17 = smov 91   ;;  %s536_s18 = smov 127   ;;  %v19_v17 = vcombine.high %v14_v16, %v14_v16  ;;  %333 = vmatprep.mubr.bf16.mxu0 %v540_v18  ;;  %v15_v21 = vld [vmem:[%s781_s0 + $0x14] sm:$0xf] }
   0x3   :  { %s537_s19 = smov 126   ;;  %s539_s22 = smov 110   ;;  %v614_v19 = vpack.c.bf16 %v14_v16, %v14_v16  ;;  %v625_v22 = vpack.c.bf16 %v15_v21, %v15_v21  ;;  %vm183_vm2 = vcmask 736256   ;;  %vm132_vm3 = vcmask 883712  }
   0x4   :  { %175 = vrot.lane.b32.xlu1 %v563_v3, %s531_s13  ;;  %171 = vrot.lane.b32.xlu0 %v565_v4, %s531_s13  ;;  %v571_v6 = vpack.c.bf16 %v18_v5, %v18_v5  ;;  %v36_v8 = vrot.slane %v563_v3, 6  ;;  %v34_v9 = vrot.slane %v565_v4, 6  ;;  %v59_v11 = vrot.slane %v563_v3, 4 }
   0x5   :  { %v57_v12 = vrot.slane %v565_v4, 4  ;;  %v82_v14 = vrot.slane %v563_v3, 2  ;;  %v80_v15 = vrot.slane %v565_v4, 2  ;;  %v616_v20 = vpack.c.bf16 %v19_v17, %v19_v17 }
   0x6   :  { %v35_v7 = vrot.slane %v571_v6, 6  ;;  %v58_v10 = vrot.slane %v571_v6, 4  ;;  %v81_v13 = vrot.slane %v571_v6, 2  ;;  %v39_v24 = vrot.slane %v625_v22, 6 }
   0x7   :  { %v38_v23 = vrot.slane %v616_v20, 6  ;;  %v37_v25 = vrot.slane %v614_v19, 6  ;;  %v61_v26 = vrot.slane %v616_v20, 4  ;;  %v62_v27 = vrot.slane %v625_v22, 4 }
   0x8   :  { %105 = vrot.lane.b32.xlu1 %v571_v6, %s532_s14  ;;  %173 = vrot.lane.b32.xlu0 %v571_v6, %s531_s13  ;;  %v60_v28 = vrot.slane %v614_v19, 4  ;;  %v84_v29 = vrot.slane %v616_v20, 2  ;;  %v85_v30 = vrot.slane %v625_v22, 2  ;;  %v83_v31 = vrot.slane %v614_v19, 2 }
   0x9   :  { %vm149_vm4 = vcmask 752640   ;;  %vm115_vm5 = vcmask 891904   ;;  %vm207_vm6 = vcmask 1043456   ;;  %vm166_vm7 = vcmask 744448  }
   0xa   :  { %vm220_vm8 = vcmask 1045504   ;;  %vm52_vm9 = vcmask 1039360   ;;  %vm75_vm10 = vcmask 1031168   ;;  %vm98_vm11 = vcmask 900096  }
   0xb   :  { %vm288_vm12 = vcmask 293888   ;;  %vm474_vm13 = vcmask 261120  }
   0xc   :  { %107 = vrot.lane.b32.xlu0 %v563_v3, %s532_s14  ;;  %122 = vrot.lane.b32.xlu1 %v35_v7, %s533_s15 }
  0x10   :  { %124 = vrot.lane.b32.xlu0 %v36_v8, %s533_s15  ;;  %103 = vrot.lane.b32.xlu1 %v565_v4, %s532_s14 }
  0x14   :  { %120 = vrot.lane.b32.xlu0 %v34_v9, %s533_s15  ;;  %139 = vrot.lane.b32.xlu1 %v58_v10, %s534_s16 }
  0x18   :  { %141 = vrot.lane.b32.xlu0 %v59_v11, %s534_s16  ;;  %137 = vrot.lane.b32.xlu1 %v57_v12, %s534_s16 }
  0x1c   :  { %156 = vrot.lane.b32.xlu0 %v81_v13, %s535_s17  ;;  %158 = vrot.lane.b32.xlu1 %v82_v14, %s535_s17 }
  0x20   :  { %154 = vrot.lane.b32.xlu0 %v80_v15, %s535_s17  ;;  %42 = vrot.lane.b32.xlu1 %v35_v7, %s536_s18 }
  0x24   :  { %44 = vrot.lane.b32.xlu0 %v36_v8, %s536_s18  ;;  %40 = vrot.lane.b32.xlu1 %v34_v9, %s536_s18 }
  0x28   :  { %65 = vrot.lane.b32.xlu0 %v58_v10, %s537_s19  ;;  %67 = vrot.lane.b32.xlu1 %v59_v11, %s537_s19 }
  0x2c   :  { %63 = vrot.lane.b32.xlu0 %v57_v12, %s537_s19  ;;  %88 = vrot.lane.b32.xlu1 %v81_v13, %s539_s22 }
  0x30   :  { %90 = vrot.lane.b32.xlu0 %v82_v14, %s539_s22  ;;  %86 = vrot.lane.b32.xlu1 %v80_v15, %s539_s22 }
  0x34   :  { %177 = vrot.lane.b32.xlu0 %v614_v19, %s531_s13  ;;  %179 = vrot.lane.b32.xlu1 %v616_v20, %s531_s13 }
  0x38   :  { %181 = vrot.lane.b32.xlu0 %v625_v22, %s531_s13  ;;  %111 = vrot.lane.b32.xlu1 %v616_v20, %s532_s14 }
  0x3c   :  { %113 = vrot.lane.b32.xlu0 %v625_v22, %s532_s14  ;;  %128 = vrot.lane.b32.xlu1 %v38_v23, %s533_s15 }
  0x40   :  { %130 = vrot.lane.b32.xlu0 %v39_v24, %s533_s15  ;;  %109 = vrot.lane.b32.xlu1 %v614_v19, %s532_s14 }
  0x44   :  { %126 = vrot.lane.b32.xlu0 %v37_v25, %s533_s15  ;;  %145 = vrot.lane.b32.xlu1 %v61_v26, %s534_s16 }
  0x48   :  { %147 = vrot.lane.b32.xlu0 %v62_v27, %s534_s16  ;;  %143 = vrot.lane.b32.xlu1 %v60_v28, %s534_s16 }
  0x4c   :  { %162 = vrot.lane.b32.xlu0 %v84_v29, %s535_s17  ;;  %164 = vrot.lane.b32.xlu1 %v85_v30, %s535_s17 }
  0x50   :  { %160 = vrot.lane.b32.xlu0 %v83_v31, %s535_s17  ;;  %48 = vrot.lane.b32.xlu1 %v38_v23, %s536_s18 }
  0x54   :  { %50 = vrot.lane.b32.xlu0 %v39_v24, %s536_s18  ;;  %46 = vrot.lane.b32.xlu1 %v37_v25, %s536_s18 }
  0x58   :  { %71 = vrot.lane.b32.xlu0 %v61_v26, %s537_s19  ;;  %73 = vrot.lane.b32.xlu1 %v62_v27, %s537_s19 }
  0x5c   :  { %69 = vrot.lane.b32.xlu0 %v60_v28, %s537_s19  ;;  %94 = vrot.lane.b32.xlu1 %v84_v29, %s539_s22 }
  0x60   :  { %96 = vrot.lane.b32.xlu0 %v85_v30, %s539_s22  ;;  %92 = vrot.lane.b32.xlu1 %v83_v31, %s539_s22 }
  0x76   :  { %v176_v32 = vpop.permute.xlu1 %175  ;;  %v172_v33 = vpop.permute.xlu0 %171 }
  0x77   :  { %v299_v34 = vsel %vm188_vm1, %v176_v32, 0 }
  0x78   :  { %498 = vmatpush3.bf16.msra.mxu1 %v299_v34 }
  0x79   :  { %499 = vmatprep.subr.bf16.mxu1 %v530_v2 }
  0x7a   :  { %v106_v35 = vpop.permute.xlu1 %105  ;;  %v174_v36 = vpop.permute.xlu0 %173 }
  0x7b   :  { %v185_v37 = vsel %vm183_vm2, %v174_v36, %v176_v32  ;;  %v184_v38 = vsel %vm183_vm2, %v172_v33, %v174_v36 }
  0x7c   :  { %483 = vmatprep.subr.msk.bf16.mxu0 %vm188_vm1, %v185_v37  ;;  %v293_v39 = vsel %vm188_vm1, %v184_v38, 0 }
  0x7d   :  { %312 = vmatpush1.bf16.msra.mxu0 %v293_v39 }
  0x7e   :  { %v108_v40 = vpop.permute.xlu0 %107  ;;  %v123_v41 = vpop.permute.xlu1 %122 }
  0x7f   :  { %v117_v50 = vsel %vm115_vm5, %v106_v35, %v108_v40 }
  0x82   :  { %v125_v42 = vpop.permute.xlu0 %124  ;;  %v104_v43 = vpop.permute.xlu1 %103 }
  0x83   :  { %v134_v48 = vsel %vm132_vm3, %v123_v41, %v125_v42  ;;  %v247_v51 = vsel %vm188_vm1, %v108_v40, %v125_v42  ;;  %v116_v62 = vsel %vm115_vm5, %v104_v43, %v106_v35 }
  0x84   :  { %v244_v52 = vsel %vm188_vm1, %v117_v50, %v134_v48 }
  0x86   :  { %v121_v44 = vpop.permute.xlu0 %120  ;;  %v140_v45 = vpop.permute.xlu1 %139 }
  0x87   :  { %v133_v56 = vsel %vm132_vm3, %v121_v44, %v123_v41 }
  0x88   :  { %v241_v63 = vsel %vm188_vm1, %v116_v62, %v133_v56 }
  0x8a   :  { %v142_v46 = vpop.permute.xlu0 %141  ;;  %v138_v47 = vpop.permute.xlu1 %137 }
  0x8b   :  { %v151_v49 = vsel %vm149_vm4, %v140_v45, %v142_v46  ;;  %v262_v53 = vsel %vm207_vm6, %v247_v51, %v142_v46  ;;  %v150_v60 = vsel %vm149_vm4, %v138_v47, %v140_v45 }
  0x8c   :  { %v260_v59 = vsel %vm207_vm6, %v244_v52, %v151_v49  ;;  %v258_v7 = vsel %vm207_vm6, %v241_v63, %v150_v60 }
  0x8e   :  { %v157_v54 = vpop.permute.xlu0 %156  ;;  %v159_v55 = vpop.permute.xlu1 %158 }
  0x8f   :  { %v168_v57 = vsel %vm166_vm7, %v157_v54, %v159_v55  ;;  %v276_v58 = vsel %vm220_vm8, %v262_v53, %v159_v55 }
  0x90   :  { %500 = vmatpush3.bf16.msra.mxu1 %v276_v58  ;;  %v273_v61 = vsel %vm220_vm8, %v260_v59, %v168_v57 }
  0x91   :  { %313 = vmatprep.subr.bf16.mxu0 %v273_v61  ;;  %501 = vmatprep.subr.bf16.mxu1 %v530_v2 }
  0x92   :  { %v155_v0 = vpop.permute.xlu0 %154  ;;  %v43_v1 = vpop.permute.xlu1 %42 }
  0x93   :  { %v167_v5 = vsel %vm166_vm7, %v155_v0, %v157_v54 }
  0x94   :  { %v270_v8 = vsel %vm220_vm8, %v258_v7, %v167_v5 }
  0x95   :  { %314 = vmatpush1.bf16.msra.mxu0 %v270_v8 }
  0x96   :  { %v45_v9 = vpop.permute.xlu0 %44  ;;  %v41_v10 = vpop.permute.xlu1 %40 }
  0x97   :  { %v54_v13 = vsel %vm52_vm9, %v43_v1, %v45_v9  ;;  %v53_v16 = vsel %vm52_vm9, %v41_v10, %v43_v1  ;;  %v197_v24 = vsel %vm188_vm1, %v563_v3, %v45_v9 }
  0x98   :  { %v194_v23 = vsel %vm188_vm1, %v571_v6, %v54_v13  ;;  %v191_v25 = vsel %vm188_vm1, %v565_v4, %v53_v16  ;;  %v707_v4 = vld [vmem:[%s782_s1] sm:$0xf] }
  0x9a   :  { %v66_v11 = vpop.permute.xlu0 %65  ;;  %v68_v12 = vpop.permute.xlu1 %67 }
  0x9b   :  { %v77_v17 = vsel %vm75_vm10, %v66_v11, %v68_v12  ;;  %v213_v26 = vsel %vm207_vm6, %v197_v24, %v68_v12 }
  0x9c   :  { %v211_v29 = vsel %vm207_vm6, %v194_v23, %v77_v17 }
  0x9e   :  { %v64_v14 = vpop.permute.xlu0 %63  ;;  %v89_v15 = vpop.permute.xlu1 %88 }
  0x9f   :  { %v76_v21 = vsel %vm75_vm10, %v64_v14, %v66_v11 }
  0xa0   :  { %v209_v6 = vsel %vm207_vm6, %v191_v25, %v76_v21 }
  0xa2   :  { %v91_v27 = vpop.permute.xlu0 %90  ;;  %v87_v28 = vpop.permute.xlu1 %86 }
  0xa3   :  { %v100_v30 = vsel %vm98_vm11, %v89_v15, %v91_v27  ;;  %v99_v31 = vsel %vm98_vm11, %v87_v28, %v89_v15  ;;  %v228_v32 = vsel %vm220_vm8, %v213_v26, %v91_v27 }
  0xa4   :  { %502 = vmatpush3.bf16.msra.mxu1 %v228_v32  ;;  %v225_v3 = vsel %vm220_vm8, %v211_v29, %v100_v30  ;;  %v222_v33 = vsel %vm220_vm8, %v209_v6, %v99_v31 }
  0xa5   :  { %315 = vmatprep.subr.bf16.mxu0 %v225_v3  ;;  %507 = vmatprep.subr.bf16.mxu1 %v530_v2 }
  0xa6   :  { %v178_v34 = vpop.permute.xlu0 %177  ;;  %316 = vmatpush1.bf16.msra.mxu0 %v222_v33  ;;  %v180_v35 = vpop.permute.xlu1 %179 }
  0xa7   :  { %504 = vmatmul.mubr.msk.bf16.vlgmr.msra.gmra.mxu1 %vm288_vm12, %v707_v4  ;;  %v186_v36 = vsel %vm183_vm2, %v178_v34, %v180_v35 }
  0xa8   :  { %513 = vmatprep.mubr.msk.bf16.mxu1 %vm538_vm0, %v530_v2  ;;  %v383_v41 = vsel %vm188_vm1, %v186_v36, 0 }
  0xa9   :  { %484 = vmatmul.mubr.msk.bf16.vlgmr.msra.gmra.mxu0 %vm288_vm12, %v707_v4 }
  0xaa   :  { %v182_v37 = vpop.permute.xlu0 %181  ;;  %v112_v38 = vpop.permute.xlu1 %111  ;;  %423 = vmatprep.mubr.bf16.mxu0 %v540_v18 }
  0xab   :  { %v187_v39 = vsel %vm183_vm2, %v180_v35, %v182_v37  ;;  %v389_v40 = vsel %vm188_vm1, %v182_v37, 0 }
  0xac   :  { %486 = vmatprep.subr.msk.bf16.mxu0 %vm188_vm1, %v187_v39  ;;  %508 = vmatpush3.bf16.msra.mxu1 %v389_v40 }
  0xad   :  { %402 = vmatpush1.bf16.msra.mxu0 %v383_v41  ;;  %509 = vmatprep.subr.bf16.mxu1 %v530_v2 }
  0xae   :  { %v114_v42 = vpop.permute.xlu0 %113  ;;  %v129_v43 = vpop.permute.xlu1 %128 }
  0xaf   :  { %v119_v51 = vsel %vm115_vm5, %v112_v38, %v114_v42 }
  0xb2   :  { %v131_v44 = vpop.permute.xlu0 %130  ;;  %v110_v45 = vpop.permute.xlu1 %109 }
  0xb3   :  { %v136_v49 = vsel %vm132_vm3, %v129_v43, %v131_v44  ;;  %v256_v52 = vsel %vm188_vm1, %v114_v42, %v131_v44  ;;  %v118_v63 = vsel %vm115_vm5, %v110_v45, %v112_v38 }
  0xb4   :  { %v253_v53 = vsel %vm188_vm1, %v119_v51, %v136_v49 }
  0xb6   :  { %v127_v46 = vpop.permute.xlu0 %126  ;;  %v146_v47 = vpop.permute.xlu1 %145 }
  0xb7   :  { %v135_v57 = vsel %vm132_vm3, %v127_v46, %v129_v43 }
  0xb8   :  { %v250_v0 = vsel %vm188_vm1, %v118_v63, %v135_v57 }
  0xba   :  { %v148_v48 = vpop.permute.xlu0 %147  ;;  %v144_v18 = vpop.permute.xlu1 %143 }
  0xbb   :  { %v153_v50 = vsel %vm149_vm4, %v146_v47, %v148_v48  ;;  %v268_v54 = vsel %vm207_vm6, %v256_v52, %v148_v48  ;;  %v152_v61 = vsel %vm149_vm4, %v144_v18, %v146_v47 }
  0xbc   :  { %v266_v60 = vsel %vm207_vm6, %v253_v53, %v153_v50  ;;  %v264_v7 = vsel %vm207_vm6, %v250_v0, %v152_v61 }
  0xbe   :  { %v163_v55 = vpop.permute.xlu0 %162  ;;  %v165_v56 = vpop.permute.xlu1 %164 }
  0xbf   :  { %v170_v58 = vsel %vm166_vm7, %v163_v55, %v165_v56  ;;  %v285_v59 = vsel %vm220_vm8, %v268_v54, %v165_v56 }
  0xc0   :  { %510 = vmatpush3.bf16.msra.mxu1 %v285_v59  ;;  %v282_v62 = vsel %vm220_vm8, %v266_v60, %v170_v58 }
  0xc1   :  { %403 = vmatprep.subr.bf16.mxu0 %v282_v62  ;;  %511 = vmatprep.subr.bf16.mxu1 %v530_v2 }
  0xc2   :  { %v161_v1 = vpop.permute.xlu0 %160  ;;  %v49_v5 = vpop.permute.xlu1 %48 }
  0xc3   :  { %v169_v8 = vsel %vm166_vm7, %v161_v1, %v163_v55 }
  0xc4   :  { %v279_v9 = vsel %vm220_vm8, %v264_v7, %v169_v8 }
  0xc5   :  { %404 = vmatpush1.bf16.msra.mxu0 %v279_v9 }
  0xc6   :  { %v51_v10 = vpop.permute.xlu0 %50  ;;  %v47_v11 = vpop.permute.xlu1 %46 }
  0xc7   :  { %v56_v14 = vsel %vm52_vm9, %v49_v5, %v51_v10  ;;  %v55_v2 = vsel %vm52_vm9, %v47_v11, %v49_v5  ;;  %v206_v24 = vsel %vm188_vm1, %v625_v22, %v51_v10 }
  0xc8   :  { %v203_v23 = vsel %vm188_vm1, %v616_v20, %v56_v14  ;;  %v200_v25 = vsel %vm188_vm1, %v614_v19, %v55_v2 }
  0xca   :  { %v72_v12 = vpop.permute.xlu0 %71  ;;  %v74_v13 = vpop.permute.xlu1 %73 }
  0xcb   :  { %v79_v17 = vsel %vm75_vm10, %v72_v12, %v74_v13  ;;  %v219_v26 = vsel %vm207_vm6, %v206_v24, %v74_v13 }
  0xcc   :  { %v217_v29 = vsel %vm207_vm6, %v203_v23, %v79_v17 }
  0xce   :  { %v70_v15 = vpop.permute.xlu0 %69  ;;  %v95_v16 = vpop.permute.xlu1 %94 }
  0xcf   :  { %v78_v21 = vsel %vm75_vm10, %v70_v15, %v72_v12 }
  0xd0   :  { %v215_v30 = vsel %vm207_vm6, %v200_v25, %v78_v21 }
  0xd2   :  { %v97_v27 = vpop.permute.xlu0 %96  ;;  %v93_v28 = vpop.permute.xlu1 %92 }
  0xd3   :  { %v102_v31 = vsel %vm98_vm11, %v95_v16, %v97_v27  ;;  %v237_v32 = vsel %vm220_vm8, %v219_v26, %v97_v27  ;;  %v101_v20 = vsel %vm98_vm11, %v93_v28, %v95_v16 }
  0xd4   :  { %512 = vmatpush3.bf16.msra.mxu1 %v237_v32  ;;  %v234_v22 = vsel %vm220_vm8, %v217_v29, %v102_v31  ;;  %v231_v6 = vsel %vm220_vm8, %v215_v30, %v101_v20 }
  0xd5   :  { %405 = vmatprep.subr.bf16.mxu0 %v234_v22 }
  0xd6   :  { %406 = vmatpush1.bf16.msra.mxu0 %v231_v6 }
  0xd7   :  { %514 = vmatmul.mubr.msk.bf16.vlgmr.msra.gmra.mxu1 %vm288_vm12, %v707_v4 }
  0xd9   :  { %487 = vmatmul.mubr.msk.bf16.vlgmr.msra.gmra.mxu0 %vm288_vm12, %v707_v4 }
 0x167   :  { %v376_v19 = vpop.f32.mrf.mxu1 }
 0x168   :  { %475 = vst.msk [vmem:[%s783_s2 + $0x10] sm:$0xff] %vm474_vm13, %v376_v19 }
 0x169   :  { %v335_v3 = vpop.f32.mrf.mxu0  ;;  %v505_v33 = vpop.f32.mrf.mxu1 }
 0x16a   :  { %472 = vst [vmem:[%s783_s2] sm:$0xff] %v335_v3 }
 0x16b   :  { %v337_v34 = vpop.f32.mrf.mxu0  ;;  %v379_v35 = vpop.f32.mrf.mxu1 }
 0x16c   :  { %473 = vst [vmem:[%s783_s2 + $0x8] sm:$0xff] %v337_v34 }
 0x16d   :  { %v339_v36 = vpop.f32.mrf.mxu0  ;;  %v506_v4 = vpop.f32.mrf.mxu1 }
 0x16f   :  { %v340_v37 = vpop.f32.mrf.mxu0 }
 0x197   :  { %v466_v38 = vpop.f32.mrf.mxu1 }
 0x198   :  { %478 = vst.msk [vmem:[%s783_s2 + $0x28] sm:$0xff] %vm474_vm13, %v466_v38 }
 0x199   :  { %v425_v39 = vpop.f32.mrf.mxu0  ;;  %v515_v40 = vpop.f32.mrf.mxu1 }
 0x19a   :  { %476 = vst [vmem:[%s783_s2 + $0x18] sm:$0xff] %v425_v39 }
 0x19b   :  { %v427_v41 = vpop.f32.mrf.mxu0  ;;  %v469_v42 = vpop.f32.mrf.mxu1 }
 0x19c   :  { %477 = vst [vmem:[%s783_s2 + $0x20] sm:$0xff] %v427_v41 }
 0x19d   :  { %v429_v43 = vpop.f32.mrf.mxu0  ;;  %v516_v44 = vpop.f32.mrf.mxu1 }
 0x19f   :  { %v430_v45 = vpop.f32.mrf.mxu0 }

</bundles_post_ra>
